<compile_context>
chip_gen: v5e
topology: v5e:2x2
jax: 0.10.0
libtpu: 0.0.40
codegen_flags: <defaults>
</compile_context>

<pallas_src>
import functools

import jax
import jax.numpy as jnp
from jax import lax
from jax.experimental import pallas as pl
from jax.experimental.pallas import tpu as pltpu

DTYPE = jnp.float32

# ---- problem sizes (small, consistent with the module) ----------------------
B = 8            # query batch
N = 8            # neighbor batch (x_n / y_n)
D_RAW = 16       # raw input features fed to the feature extractor
FE_HIDDEN = 32   # feature-extractor hidden width
INPUT_SIZE = 32  # feature-extractor out_features  (== NONA_NN.input_size)
HL = 32          # hl_sizes = [32]
CLASSES = 3      # multiclass
BN_EPS = 1e-5

# ---- parameter-slab layout (rows of a [SLAB_ROWS, 32] f32 array) ------------
# All weight blocks start on 8-row-aligned offsets; the vector block holds the
# 7 bias/gamma/beta rows (+1 pad row) in a single (8, 32) tile.
ROW_FE_W1 = 0                       # [16, 32]  fe W1^T   (in, out)
ROW_FE_W2 = ROW_FE_W1 + D_RAW       # [32, 32]  fe W2^T
ROW_MLP_W = ROW_FE_W2 + FE_HIDDEN   # [32, 32]  mlp W^T
ROW_VECS = ROW_MLP_W + INPUT_SIZE   # [8, 32]   fe_b1, fe_b2, in_g, in_b,
                                    #           mlp_b, mlp_g, mlp_be, pad
SLAB_ROWS = ROW_VECS + 8            # 88
SLAB_COLS = 32


# ============================ fused Pallas kernel =============================
def _nona_ft_kernel(z_ref, yn_ref, slab_ref, o_ref, *, nb, check_same, eps):
    f32 = jnp.float32
    total = z_ref.shape[0]          # B + N
    nn_ = total - nb                # neighbor rows
    classes = o_ref.shape[1]

    z = z_ref[...]                  # [B+N, D_RAW], x rows first

    # --- parameters: one slab, static 8-row-aligned slices --------------------
    w1 = slab_ref[pl.ds(ROW_FE_W1, D_RAW), :]        # [16, 32]  W1^T
    w2 = slab_ref[pl.ds(ROW_FE_W2, FE_HIDDEN), :]    # [32, 32]  W2^T
    wm = slab_ref[pl.ds(ROW_MLP_W, INPUT_SIZE), :]   # [32, 32]  Wm^T
    vecs = slab_ref[pl.ds(ROW_VECS, 8), :]           # [8, 32]   one vreg
    fb1, fb2 = vecs[0:1], vecs[1:2]
    ig, ib = vecs[2:3], vecs[3:4]
    mb, mg, mbe = vecs[4:5], vecs[5:6], vecs[6:7]

    # --- selector matrix for per-half BN statistics (built in vregs) ---------
    # row 0 averages the x half (first nb rows), row 1 averages the x_n half.
    half = lax.broadcasted_iota(jnp.int32, (2, total), 0)
    col = lax.broadcasted_iota(jnp.int32, (2, total), 1)
    top = col < nb
    sel = jnp.where(half == 0,
                    jnp.where(top, 1.0 / nb, 0.0),
                    jnp.where(top, 0.0, 1.0 / nn_)).astype(f32)      # [2, B+N]

    def bn_halves(v, gamma, beta):
        # Training-mode BatchNorm1d applied separately to each half, as the
        # reference's two forward calls.  Batch mean and E[v^2] via two tiny
        # MXU matmuls -> stats land in (2, F) lane layout; biased variance.
        mean = jnp.dot(sel, v, preferred_element_type=f32)           # [2, F]
        msq = jnp.dot(sel, v * v, preferred_element_type=f32)        # [2, F]
        var = jnp.maximum(msq - mean * mean, 0.0)
        scale = lax.rsqrt(var + eps) * gamma                         # [2, F]
        shift = beta - mean * scale                                  # [2, F]
        return (v[:nb] * scale[0:1] + shift[0:1],
                v[nb:] * scale[1:2] + shift[1:2])

    # --- feature extractor: Linear(16->32) -> ReLU -> Linear(32->32) ---------
    # x and x_n run stacked through every row-wise op.
    h = jnp.maximum(jnp.dot(z, w1, preferred_element_type=f32) + fb1, 0.0)
    g = jnp.dot(h, w2, preferred_element_type=f32) + fb2             # [B+N, 32]

    # --- NONA_NN: input_norm, then Linear -> Tanh -> BatchNorm ---------------
    f, fn = bn_halves(g, ig, ib)
    t = jnp.concatenate([f, fn], axis=0)                             # 8-aligned
    t = jnp.tanh(jnp.dot(t, wm, preferred_element_type=f32) + mb)
    f, fn = bn_halves(t, mg, mbe)                                    # [B,32],[N,32]

    # --- NONA readout (euclidean, agg=None) ----------------------------------
    # sim = -cdist(f, fn); only the cross term needs a full matmul.
    cross = lax.dot_general(f, fn, (((1,), (1,)), ((), ())),
                            preferred_element_type=f32)              # [B, N]
    sq_x = jnp.sum(f * f, axis=1, keepdims=True)                     # [B, 1]
    # [1, N] squared-norm row via a 1-row matmul (result already lane-layout).
    ones_row = jnp.ones((1, fn.shape[1]), f32)
    sq_n = lax.dot_general(ones_row, fn * fn, (((1,), (1,)), ((), ())),
                           preferred_element_type=f32)               # [1, N]
    d2 = jnp.maximum(sq_x + sq_n - 2.0 * cross, 0.0)
    sim = -jnp.sqrt(d2)

    if check_same:
        # torch.equal check on the raw inputs (off the FE/BN/MLP critical
        # path).  Reference compares the processed features; since processing
        # is deterministic, raw equality implies feature equality.
        eq = jnp.all(z[:nb] == z[nb:])
        rows = lax.broadcasted_iota(jnp.int32, (nb, nn_), 0)
        cols = lax.broadcasted_iota(jnp.int32, (nb, nn_), 1)
        sim = jnp.where(jnp.logical_and(eq, rows == cols), -jnp.inf, sim)

    # softmax over neighbors (exact divide: rows must sum to 1)
    row_max = jnp.max(sim, axis=1, keepdims=True)
    p = jnp.exp(sim - row_max)
    probs = p / jnp.sum(p, axis=1, keepdims=True)

    # one-hot the neighbor labels in-kernel, then probs @ y_ohe
    cls_iota = lax.broadcasted_iota(jnp.int32, (nn_, classes), 1)
    y_ohe = (cls_iota == yn_ref[...]).astype(f32)                    # [N, C]
    out = jnp.dot(probs, y_ohe, preferred_element_type=f32)
    # NONA_NN multiclass: torch.clip(..., 0, 1)
    o_ref[...] = jnp.clip(out, 0.0, 1.0).astype(o_ref.dtype)


# ============================ wrapper / params ================================
def init_params(key):
    """Build all weights and pack them into one lane-dense f32 [88, 32] slab."""
    ks = jax.random.split(key, 3)

    def lin_init(k, fin, fout):
        bound = 1.0 / (fin ** 0.5)
        kw, kb = jax.random.split(k)
        w_t = jax.random.uniform(kw, (fin, fout), DTYPE, -bound, bound)  # W^T
        b = jax.random.uniform(kb, (fout,), DTYPE, -bound, bound)
        return w_t, b

    fe_w1t, fe_b1 = lin_init(ks[0], D_RAW, FE_HIDDEN)
    fe_w2t, fe_b2 = lin_init(ks[1], FE_HIDDEN, INPUT_SIZE)
    mlp_wt, mlp_b = lin_init(ks[2], INPUT_SIZE, HL)
    in_gamma = jnp.ones((INPUT_SIZE,), DTYPE)
    in_beta = jnp.zeros((INPUT_SIZE,), DTYPE)
    mlp_gamma = jnp.ones((HL,), DTYPE)
    mlp_beta = jnp.zeros((HL,), DTYPE)

    vecs = jnp.stack([fe_b1, fe_b2, in_gamma, in_beta,
                      mlp_b, mlp_gamma, mlp_beta,
                      jnp.zeros((SLAB_COLS,), DTYPE)], axis=0)       # [8, 32]
    slab = jnp.concatenate([fe_w1t, fe_w2t, mlp_wt, vecs], axis=0)   # [88, 32]
    assert slab.shape == (SLAB_ROWS, SLAB_COLS)
    return {"slab": slab}


def nona_ft_forward(params, x, x_n, y_n):
    """Full NONA_FT forward in a single fused, gridless pallas_call."""
    nb = x.shape[0]
    z = jnp.concatenate([x, x_n], axis=0)            # [B+N, D_RAW], one DMA
    y2 = y_n.reshape(-1, 1).astype(jnp.int32)        # [N, 1]
    # torch.equal(x, x_n) can only be True when shapes match (static check).
    check_same = x.shape[0] == x_n.shape[0]
    vmem = pl.BlockSpec(memory_space=pltpu.MemorySpace.VMEM)
    return pl.pallas_call(
        functools.partial(_nona_ft_kernel, nb=nb,
                          check_same=check_same, eps=BN_EPS),
        out_shape=jax.ShapeDtypeStruct((nb, CLASSES), x.dtype),
        in_specs=[vmem, vmem, vmem],
        out_specs=vmem,
    )(z, y2, params["slab"])


if __name__ == "__main__":
    key = jax.random.PRNGKey(0)
    kx, kn = jax.random.split(key)
    x = jax.random.normal(kx, (B, D_RAW), DTYPE)
    x_n = jax.random.normal(kn, (N, D_RAW), DTYPE)
    y_n = jnp.arange(N, dtype=jnp.int32) % CLASSES   # labels cover all classes

    params = init_params(jax.random.PRNGKey(42))

    out = jax.jit(nona_ft_forward)(params, x, x_n, y_n)
    jax.block_until_ready(out)
    assert out.shape == (B, CLASSES)
    assert bool(jnp.all(jnp.isfinite(out)))
    assert bool(jnp.all(out >= 0.0)) and bool(jnp.all(out <= 1.0))
    print("KERNEL_OK")
</pallas_src>

<mosaic_0001>
module attributes {stable_mosaic.version = 11 : i64} {
  func.func @_nona_ft_kernel(%arg0: memref<16x16xf32, #tpu.memory_space<vmem>>, %arg1: memref<8x1xi32, #tpu.memory_space<vmem>>, %arg2: memref<88x32xf32, #tpu.memory_space<vmem>>, %arg3: memref<8x3xf32, #tpu.memory_space<vmem>>) attributes {dimension_semantics = [], scalar_prefetch = 0 : i64, scratch_operands = 0 : i64, tpu.core_type = #tpu.core_type<tc>} {
    %c0 = arith.constant 0 : index
    %c0_0 = arith.constant 0 : index
    %0 = vector.load %arg0[%c0, %c0_0] : memref<16x16xf32, #tpu.memory_space<vmem>>, vector<16x16xf32>
    %c0_1 = arith.constant 0 : index
    %c0_2 = arith.constant 0 : index
    %1 = vector.load %arg2[%c0_1, %c0_2] : memref<88x32xf32, #tpu.memory_space<vmem>>, vector<16x32xf32>
    %c16 = arith.constant 16 : index
    %c0_3 = arith.constant 0 : index
    %2 = vector.load %arg2[%c16, %c0_3] : memref<88x32xf32, #tpu.memory_space<vmem>>, vector<32x32xf32>
    %c48 = arith.constant 48 : index
    %c0_4 = arith.constant 0 : index
    %3 = vector.load %arg2[%c48, %c0_4] : memref<88x32xf32, #tpu.memory_space<vmem>>, vector<32x32xf32>
    %c80 = arith.constant 80 : index
    %c0_5 = arith.constant 0 : index
    %4 = vector.load %arg2[%c80, %c0_5] : memref<88x32xf32, #tpu.memory_space<vmem>>, vector<8x32xf32>
    %5 = vector.extract_strided_slice %4 {offsets = [0, 0], sizes = [1, 32], strides = [1, 1]} : vector<8x32xf32> to vector<1x32xf32>
    %6 = vector.extract_strided_slice %4 {offsets = [1, 0], sizes = [1, 32], strides = [1, 1]} : vector<8x32xf32> to vector<1x32xf32>
    %7 = vector.extract_strided_slice %4 {offsets = [2, 0], sizes = [1, 32], strides = [1, 1]} : vector<8x32xf32> to vector<1x32xf32>
    %8 = vector.extract_strided_slice %4 {offsets = [3, 0], sizes = [1, 32], strides = [1, 1]} : vector<8x32xf32> to vector<1x32xf32>
    %9 = vector.extract_strided_slice %4 {offsets = [4, 0], sizes = [1, 32], strides = [1, 1]} : vector<8x32xf32> to vector<1x32xf32>
    %10 = vector.extract_strided_slice %4 {offsets = [5, 0], sizes = [1, 32], strides = [1, 1]} : vector<8x32xf32> to vector<1x32xf32>
    %11 = vector.extract_strided_slice %4 {offsets = [6, 0], sizes = [1, 32], strides = [1, 1]} : vector<8x32xf32> to vector<1x32xf32>
    %12 = tpu.iota {dimensions = array<i32: 0>} : vector<2x16xi32>
    %13 = tpu.iota {dimensions = array<i32: 1>} : vector<2x16xi32>
    %c8_i32 = arith.constant 8 : i32
    %14 = vector.broadcast %c8_i32 : i32 to vector<2x16xi32>
    %15 = arith.cmpi slt, %13, %14 : vector<2x16xi32>
    %c0_i32 = arith.constant 0 : i32
    %16 = vector.broadcast %c0_i32 : i32 to vector<2x16xi32>
    %17 = arith.cmpi eq, %12, %16 : vector<2x16xi32>
    %cst = arith.constant 1.250000e-01 : f32
    %cst_6 = arith.constant 0.000000e+00 : f32
    %18 = vector.broadcast %cst : f32 to vector<2x16xf32>
    %19 = vector.broadcast %cst_6 : f32 to vector<2x16xf32>
    %20 = arith.select %15, %18, %19 : vector<2x16xi1>, vector<2x16xf32>
    %cst_7 = arith.constant 0.000000e+00 : f32
    %cst_8 = arith.constant 1.250000e-01 : f32
    %21 = vector.broadcast %cst_7 : f32 to vector<2x16xf32>
    %22 = vector.broadcast %cst_8 : f32 to vector<2x16xf32>
    %23 = arith.select %15, %21, %22 : vector<2x16xi1>, vector<2x16xf32>
    %24 = arith.select %17, %20, %23 : vector<2x16xi1>, vector<2x16xf32>
    %cst_9 = arith.constant dense<0.000000e+00> : vector<16x32xf32>
    %25 = tpu.matmul %0, %1, %cst_9 {dimension_numbers = #tpu.dot_dimension_numbers<[1], [0], [0], [1], [0, 0, 1, 1], [], []>} : vector<16x16xf32>, vector<16x32xf32>, vector<16x32xf32> -> vector<16x32xf32>
    %26 = vector.broadcast %5 : vector<1x32xf32> to vector<16x32xf32>
    %27 = arith.addf %25, %26 : vector<16x32xf32>
    %cst_10 = arith.constant 0.000000e+00 : f32
    %28 = vector.broadcast %cst_10 : f32 to vector<16x32xf32>
    %29 = arith.maximumf %27, %28 : vector<16x32xf32>
    %cst_11 = arith.constant dense<0.000000e+00> : vector<16x32xf32>
    %30 = tpu.matmul %29, %2, %cst_11 {dimension_numbers = #tpu.dot_dimension_numbers<[1], [0], [0], [1], [0, 0, 1, 1], [], []>} : vector<16x32xf32>, vector<32x32xf32>, vector<16x32xf32> -> vector<16x32xf32>
    %31 = vector.broadcast %6 : vector<1x32xf32> to vector<16x32xf32>
    %32 = arith.addf %30, %31 : vector<16x32xf32>
    %cst_12 = arith.constant dense<0.000000e+00> : vector<2x32xf32>
    %33 = tpu.matmul %24, %32, %cst_12 {dimension_numbers = #tpu.dot_dimension_numbers<[1], [0], [0], [1], [0, 0, 1, 1], [], []>} : vector<2x16xf32>, vector<16x32xf32>, vector<2x32xf32> -> vector<2x32xf32>
    %34 = arith.mulf %32, %32 : vector<16x32xf32>
    %cst_13 = arith.constant dense<0.000000e+00> : vector<2x32xf32>
    %35 = tpu.matmul %24, %34, %cst_13 {dimension_numbers = #tpu.dot_dimension_numbers<[1], [0], [0], [1], [0, 0, 1, 1], [], []>} : vector<2x16xf32>, vector<16x32xf32>, vector<2x32xf32> -> vector<2x32xf32>
    %36 = arith.mulf %33, %33 : vector<2x32xf32>
    %37 = arith.subf %35, %36 : vector<2x32xf32>
    %cst_14 = arith.constant 0.000000e+00 : f32
    %38 = vector.broadcast %cst_14 : f32 to vector<2x32xf32>
    %39 = arith.maximumf %37, %38 : vector<2x32xf32>
    %cst_15 = arith.constant 9.99999974E-6 : f32
    %40 = vector.broadcast %cst_15 : f32 to vector<2x32xf32>
    %41 = arith.addf %39, %40 : vector<2x32xf32>
    %42 = math.rsqrt %41 : vector<2x32xf32>
    %43 = vector.broadcast %7 : vector<1x32xf32> to vector<2x32xf32>
    %44 = arith.mulf %42, %43 : vector<2x32xf32>
    %45 = arith.mulf %33, %44 : vector<2x32xf32>
    %46 = vector.broadcast %8 : vector<1x32xf32> to vector<2x32xf32>
    %47 = arith.subf %46, %45 : vector<2x32xf32>
    %48 = vector.extract_strided_slice %32 {offsets = [0, 0], sizes = [8, 32], strides = [1, 1]} : vector<16x32xf32> to vector<8x32xf32>
    %49 = vector.extract_strided_slice %44 {offsets = [0, 0], sizes = [1, 32], strides = [1, 1]} : vector<2x32xf32> to vector<1x32xf32>
    %50 = vector.broadcast %49 : vector<1x32xf32> to vector<8x32xf32>
    %51 = arith.mulf %48, %50 : vector<8x32xf32>
    %52 = vector.extract_strided_slice %47 {offsets = [0, 0], sizes = [1, 32], strides = [1, 1]} : vector<2x32xf32> to vector<1x32xf32>
    %53 = vector.broadcast %52 : vector<1x32xf32> to vector<8x32xf32>
    %54 = arith.addf %51, %53 : vector<8x32xf32>
    %55 = vector.extract_strided_slice %32 {offsets = [8, 0], sizes = [8, 32], strides = [1, 1]} : vector<16x32xf32> to vector<8x32xf32>
    %56 = vector.extract_strided_slice %44 {offsets = [1, 0], sizes = [1, 32], strides = [1, 1]} : vector<2x32xf32> to vector<1x32xf32>
    %57 = vector.broadcast %56 : vector<1x32xf32> to vector<8x32xf32>
    %58 = arith.mulf %55, %57 : vector<8x32xf32>
    %59 = vector.extract_strided_slice %47 {offsets = [1, 0], sizes = [1, 32], strides = [1, 1]} : vector<2x32xf32> to vector<1x32xf32>
    %60 = vector.broadcast %59 : vector<1x32xf32> to vector<8x32xf32>
    %61 = arith.addf %58, %60 : vector<8x32xf32>
    %62 = tpu.concatenate %54, %61 in 0 : vector<8x32xf32>, vector<8x32xf32> -> vector<16x32xf32>
    %cst_16 = arith.constant dense<0.000000e+00> : vector<16x32xf32>
    %63 = tpu.matmul %62, %3, %cst_16 {dimension_numbers = #tpu.dot_dimension_numbers<[1], [0], [0], [1], [0, 0, 1, 1], [], []>} : vector<16x32xf32>, vector<32x32xf32>, vector<16x32xf32> -> vector<16x32xf32>
    %64 = vector.broadcast %9 : vector<1x32xf32> to vector<16x32xf32>
    %65 = arith.addf %63, %64 : vector<16x32xf32>
    %66 = math.tanh %65 : vector<16x32xf32>
    %cst_17 = arith.constant dense<0.000000e+00> : vector<2x32xf32>
    %67 = tpu.matmul %24, %66, %cst_17 {dimension_numbers = #tpu.dot_dimension_numbers<[1], [0], [0], [1], [0, 0, 1, 1], [], []>} : vector<2x16xf32>, vector<16x32xf32>, vector<2x32xf32> -> vector<2x32xf32>
    %68 = arith.mulf %66, %66 : vector<16x32xf32>
    %cst_18 = arith.constant dense<0.000000e+00> : vector<2x32xf32>
    %69 = tpu.matmul %24, %68, %cst_18 {dimension_numbers = #tpu.dot_dimension_numbers<[1], [0], [0], [1], [0, 0, 1, 1], [], []>} : vector<2x16xf32>, vector<16x32xf32>, vector<2x32xf32> -> vector<2x32xf32>
    %70 = arith.mulf %67, %67 : vector<2x32xf32>
    %71 = arith.subf %69, %70 : vector<2x32xf32>
    %cst_19 = arith.constant 0.000000e+00 : f32
    %72 = vector.broadcast %cst_19 : f32 to vector<2x32xf32>
    %73 = arith.maximumf %71, %72 : vector<2x32xf32>
    %cst_20 = arith.constant 9.99999974E-6 : f32
    %74 = vector.broadcast %cst_20 : f32 to vector<2x32xf32>
    %75 = arith.addf %73, %74 : vector<2x32xf32>
    %76 = math.rsqrt %75 : vector<2x32xf32>
    %77 = vector.broadcast %10 : vector<1x32xf32> to vector<2x32xf32>
    %78 = arith.mulf %76, %77 : vector<2x32xf32>
    %79 = arith.mulf %67, %78 : vector<2x32xf32>
    %80 = vector.broadcast %11 : vector<1x32xf32> to vector<2x32xf32>
    %81 = arith.subf %80, %79 : vector<2x32xf32>
    %82 = vector.extract_strided_slice %66 {offsets = [0, 0], sizes = [8, 32], strides = [1, 1]} : vector<16x32xf32> to vector<8x32xf32>
    %83 = vector.extract_strided_slice %78 {offsets = [0, 0], sizes = [1, 32], strides = [1, 1]} : vector<2x32xf32> to vector<1x32xf32>
    %84 = vector.broadcast %83 : vector<1x32xf32> to vector<8x32xf32>
    %85 = arith.mulf %82, %84 : vector<8x32xf32>
    %86 = vector.extract_strided_slice %81 {offsets = [0, 0], sizes = [1, 32], strides = [1, 1]} : vector<2x32xf32> to vector<1x32xf32>
    %87 = vector.broadcast %86 : vector<1x32xf32> to vector<8x32xf32>
    %88 = arith.addf %85, %87 : vector<8x32xf32>
    %89 = vector.extract_strided_slice %66 {offsets = [8, 0], sizes = [8, 32], strides = [1, 1]} : vector<16x32xf32> to vector<8x32xf32>
    %90 = vector.extract_strided_slice %78 {offsets = [1, 0], sizes = [1, 32], strides = [1, 1]} : vector<2x32xf32> to vector<1x32xf32>
    %91 = vector.broadcast %90 : vector<1x32xf32> to vector<8x32xf32>
    %92 = arith.mulf %89, %91 : vector<8x32xf32>
    %93 = vector.extract_strided_slice %81 {offsets = [1, 0], sizes = [1, 32], strides = [1, 1]} : vector<2x32xf32> to vector<1x32xf32>
    %94 = vector.broadcast %93 : vector<1x32xf32> to vector<8x32xf32>
    %95 = arith.addf %92, %94 : vector<8x32xf32>
    %cst_21 = arith.constant dense<0.000000e+00> : vector<8x8xf32>
    %96 = tpu.matmul %88, %95, %cst_21 {dimension_numbers = #tpu.dot_dimension_numbers<[1], [1], [0], [0], [0, 0, 1, 0], [], []>} : vector<8x32xf32>, vector<8x32xf32>, vector<8x8xf32> -> vector<8x8xf32>
    %97 = arith.mulf %88, %88 : vector<8x32xf32>
    %cst_22 = arith.constant dense<0.000000e+00> : vector<8xf32>
    %98 = vector.multi_reduction <add>, %97, %cst_22 [1] : vector<8x32xf32> to vector<8xf32>
    %99 = vector.shape_cast %98 : vector<8xf32> to vector<8x1xf32>
    %cst_23 = arith.constant 1.000000e+00 : f32
    %100 = vector.broadcast %cst_23 : f32 to vector<1x32xf32>
    %101 = arith.mulf %95, %95 : vector<8x32xf32>
    %cst_24 = arith.constant dense<0.000000e+00> : vector<1x8xf32>
    %102 = tpu.matmul %100, %101, %cst_24 {dimension_numbers = #tpu.dot_dimension_numbers<[1], [1], [0], [0], [0, 0, 1, 0], [], []>} : vector<1x32xf32>, vector<8x32xf32>, vector<1x8xf32> -> vector<1x8xf32>
    %103 = vector.broadcast %99 : vector<8x1xf32> to vector<8x8xf32>
    %104 = vector.broadcast %102 : vector<1x8xf32> to vector<8x8xf32>
    %105 = arith.addf %103, %104 : vector<8x8xf32>
    %cst_25 = arith.constant 2.000000e+00 : f32
    %106 = vector.broadcast %cst_25 : f32 to vector<8x8xf32>
    %107 = arith.mulf %106, %96 : vector<8x8xf32>
    %108 = arith.subf %105, %107 : vector<8x8xf32>
    %cst_26 = arith.constant 0.000000e+00 : f32
    %109 = vector.broadcast %cst_26 : f32 to vector<8x8xf32>
    %110 = arith.maximumf %108, %109 : vector<8x8xf32>
    %111 = math.sqrt %110 : vector<8x8xf32>
    %cst_27 = arith.constant 0.000000e+00 : f32
    %112 = vector.broadcast %cst_27 : f32 to vector<8x8xf32>
    %113 = arith.subf %112, %111 : vector<8x8xf32>
    %114 = vector.extract_strided_slice %0 {offsets = [0, 0], sizes = [8, 16], strides = [1, 1]} : vector<16x16xf32> to vector<8x16xf32>
    %115 = vector.extract_strided_slice %0 {offsets = [8, 0], sizes = [8, 16], strides = [1, 1]} : vector<16x16xf32> to vector<8x16xf32>
    %116 = arith.cmpf oeq, %114, %115 : vector<8x16xf32>
    %cst_28 = arith.constant 1.000000e+00 : f32
    %cst_29 = arith.constant 0.000000e+00 : f32
    %117 = vector.broadcast %cst_28 : f32 to vector<8x16xf32>
    %118 = vector.broadcast %cst_29 : f32 to vector<8x16xf32>
    %119 = arith.select %116, %117, %118 : vector<8x16xi1>, vector<8x16xf32>
    %120 = vector.shape_cast %119 : vector<8x16xf32> to vector<1x8x16xf32>
    %cst_30 = arith.constant dense<0x7F800000> : vector<1xf32>
    %121 = vector.multi_reduction <minimumf>, %120, %cst_30 [1, 2] : vector<1x8x16xf32> to vector<1xf32>
    %122 = vector.shape_cast %121 : vector<1xf32> to vector<1x1x1xf32>
    %123 = vector.extract %122[0, 0, 0] : f32 from vector<1x1x1xf32>
    %cst_31 = arith.constant 0.000000e+00 : f32
    %124 = arith.cmpf ogt, %123, %cst_31 : f32
    %125 = tpu.iota {dimensions = array<i32: 0>} : vector<8x8xi32>
    %126 = tpu.iota {dimensions = array<i32: 1>} : vector<8x8xi32>
    %127 = arith.cmpi eq, %125, %126 : vector<8x8xi32>
    %128 = vector.broadcast %124 : i1 to vector<8x8xi1>
    %129 = arith.andi %128, %127 : vector<8x8xi1>
    %cst_32 = arith.constant 0xFF800000 : f32
    %130 = vector.broadcast %cst_32 : f32 to vector<8x8xf32>
    %131 = arith.select %129, %130, %113 : vector<8x8xi1>, vector<8x8xf32>
    %cst_33 = arith.constant dense<0xFF800000> : vector<8xf32>
    %132 = vector.multi_reduction <maximumf>, %131, %cst_33 [1] : vector<8x8xf32> to vector<8xf32>
    %133 = vector.shape_cast %132 : vector<8xf32> to vector<8x1xf32>
    %134 = vector.broadcast %133 : vector<8x1xf32> to vector<8x8xf32>
    %135 = arith.subf %131, %134 : vector<8x8xf32>
    %136 = math.exp %135 : vector<8x8xf32>
    %cst_34 = arith.constant dense<0.000000e+00> : vector<8xf32>
    %137 = vector.multi_reduction <add>, %136, %cst_34 [1] : vector<8x8xf32> to vector<8xf32>
    %138 = vector.shape_cast %137 : vector<8xf32> to vector<8x1xf32>
    %139 = vector.broadcast %138 : vector<8x1xf32> to vector<8x8xf32>
    %140 = arith.divf %136, %139 : vector<8x8xf32>
    %141 = tpu.iota {dimensions = array<i32: 1>} : vector<8x3xi32>
    %c0_35 = arith.constant 0 : index
    %c0_36 = arith.constant 0 : index
    %142 = vector.load %arg1[%c0_35, %c0_36] : memref<8x1xi32, #tpu.memory_space<vmem>>, vector<8x1xi32>
    %143 = vector.broadcast %142 : vector<8x1xi32> to vector<8x3xi32>
    %144 = arith.cmpi eq, %141, %143 : vector<8x3xi32>
    %145 = arith.extui %144 : vector<8x3xi1> to vector<8x3xi32>
    %146 = arith.sitofp %145 : vector<8x3xi32> to vector<8x3xf32>
    %cst_37 = arith.constant dense<0.000000e+00> : vector<8x3xf32>
    %147 = tpu.matmul %140, %146, %cst_37 {dimension_numbers = #tpu.dot_dimension_numbers<[1], [0], [0], [1], [0, 0, 1, 1], [], []>} : vector<8x8xf32>, vector<8x3xf32>, vector<8x3xf32> -> vector<8x3xf32>
    %cst_38 = arith.constant 0.000000e+00 : f32
    %cst_39 = arith.constant 1.000000e+00 : f32
    %148 = vector.broadcast %cst_38 : f32 to vector<8x3xf32>
    %149 = arith.maximumf %148, %147 : vector<8x3xf32>
    %150 = vector.broadcast %cst_39 : f32 to vector<8x3xf32>
    %151 = arith.minimumf %150, %149 : vector<8x3xf32>
    %c0_40 = arith.constant 0 : index
    %c0_41 = arith.constant 0 : index
    %152 = vector.load %arg3[%c0_40, %c0_41] : memref<8x3xf32, #tpu.memory_space<vmem>>, vector<8x3xf32>
    tpu.vector_store %arg3[%c0_40, %c0_41], %151 {strides = array<i32>} : memref<8x3xf32, #tpu.memory_space<vmem>>, vector<8x3xf32>,
    return
  }
}

</mosaic_0001>

<bundles_post_ra>
// kernel: nona_ft_forward.1
= control target key start
LH: loop header
LB: loop body
LE: loop exit
PB: predicated region body
PF: predicated region fallthrough
CT: control target
= control target key end

     0   :  { %vm37_vm0 = vcmask 130048   ;;  %vm70_vm1 = vcmask 261120   ;;  %v27_v16 = vlaneseq  ;;  %v469_v22 = vmov 0.0   ;;  %s591_s2 = inlined_call_operand.vmem [shape: f32[88,32], index: 2, kind: input, shape index: {}]   ;;  %s592_s0 = inlined_call_operand.vmem [shape: f32[16,16], index: 0, kind: input, shape index: {}]   ;;  %s593_s1 = inlined_call_operand.vmem [shape: s32[8,1], index: 1, kind: input, shape index: {}]   ;;  %s594_s3 = inlined_call_operand.vmem [shape: f32[8,3], index: 3, kind: output, shape index: {}]  }
   0x1   :  { %v17_v0 = vld [vmem:[%s591_s2 + $0x8] sm:$0xff]  ;;  %v16_v1 = vld [vmem:[%s591_s2] sm:$0xff]  ;;  %v19_v6 = vld [vmem:[%s591_s2 + $0x18] sm:$0xff]  ;;  %v470_v24 = vmov 0.125   ;;  %vm367_vm15 = vcmask 64512  }
   0x2   :  { %58 = vmatpush.msra.mxu0 %v17_v0  ;;  %v502_v2 = vld [vmem:[%s592_s0] sm:$0xff]  ;;  %v21_v3 = vld [vmem:[%s591_s2 + $0x28] sm:$0xff]  ;;  %v18_v7 = vld [vmem:[%s591_s2 + $0x10] sm:$0xff]  ;;  %v533_v18 = vand.u32 127, %v27_v16  ;;  %v535_v19 = vshrl.u32 %v27_v16, 7 }
   0x3   :  { %89 = vmatpush.msra.mxu1 %v21_v3  ;;  %v512_v4 = vld [vmem:[%s592_s0 + $0x8] sm:$0xff]  ;;  %v20_v5 = vld [vmem:[%s591_s2 + $0x20] sm:$0xff]  ;;  %v528_v8 = vld [vmem:[%s591_s2 + $0x50] sm:$0xff] }
   0x4   :  { %59 = vmatpush.msra.mxu0 %v16_v1  ;;  %v36_v9 = vperm.slane %v528_v8, 0  ;;  %v69_v20 = vperm.slane %v528_v8, 1  ;;  %vm31_vm2 = vcmp.lt.s32.totalorder %v533_v18, 8  ;;  %vm32_vm3 = vcmp.eq.s32.totalorder %v535_v19, 0  ;;  %v25_v31 = vld [vmem:[%s591_s2 + $0x48] sm:$0xff]  ;;  %v24_v32 = vld [vmem:[%s591_s2 + $0x40] sm:$0xff] }
   0x5   :  { %430 = vmatmul.msk.f32.vlgmr.msra.gmra.mxu0 %vm37_vm0, %v502_v2  ;;  %90 = vmatpush.msra.mxu1 %v20_v5  ;;  %v33_v23 = vsel %vm31_vm2, 0.125, %v469_v22  ;;  %v34_v25 = vsel %vm31_vm2, 0.0, %v470_v24  ;;  %v23_v33 = vld [vmem:[%s591_s2 + $0x38] sm:$0xff]  ;;  %v22_v34 = vld [vmem:[%s591_s2 + $0x30] sm:$0xff]  ;;  %v159_v46 = vperm.slane %v528_v8, 2  ;;  %v162_v50 = vperm.slane %v528_v8, 3 }
   0x6   :  { %v541_v29 = vsel %vm32_vm3, %v33_v23, %v34_v25  ;;  %v172_v62 = vperm.slane %v528_v8, 4  ;;  %vm348_vm7 = vcmp.eq.f32.partialorder %v502_v2, %v512_v4  ;;  %v260_v2 = vperm.slane %v528_v8, 5 }
   0x7   :  { %91 = vmatpush.msra.mxu1 %v19_v6  ;;  %vm361_vm14 = vcmp.eq.s32.totalorder %v535_v19, %v533_v18 }
   0x9   :  { %92 = vmatpush.msra.mxu1 %v18_v7 }
   0xd   :  { %431 = vmatmul.msk.f32.gmra.mxu0 %vm37_vm0, %v512_v4 }
  0x82   :  { %v61_v10 = vpop.f32.mrf.mxu0 }
  0x83   :  { %v62_v11 = vadd.f32 %v61_v10, %v36_v9 }
  0x85   :  { %v67_v12 = vmax.f32 %v62_v11, 0.0 }
  0x87   :  { %432 = vmatmul.msk.f32.vlgmr.msra.gmra.mxu1 %vm70_vm1, %v67_v12 }
  0x8a   :  { %v64_v13 = vpop.f32.mrf.mxu0 }
  0x8b   :  { %v65_v14 = vadd.f32 %v64_v13, %v36_v9  ;;  %v349_v9 = vsel %vm348_vm7, 1.0, %v469_v22 }
  0x8c   :  { %v350_v10 = vsel %vm37_vm0, %v349_v9, inf  ;;  %v472_v9 = vmov 0  }
  0x8d   :  { %v68_v15 = vmax.f32 %v65_v14, 0.0  ;;  %351 = vmin.xlane.f32.xlu0 %v350_v10  ;;  %453 = vset.pattern.permute.xlu2 %v472_v9 }
  0x8e   :  { %454 = vset.pattern.permute.xlu0 %v472_v9 }
  0x8f   :  { %433 = vmatmul.msk.f32.gmra.mxu1 %vm70_vm1, %v68_v15 }
 0x104   :  { %v94_v17 = vpop.f32.mrf.mxu1 }
 0x105   :  { %v95_v26 = vadd.f32 %v94_v17, %v69_v20 }
 0x107   :  { %v123_v30 = vmul.f32 %v95_v26, %v95_v26 }
 0x10c   :  { %v97_v21 = vpop.f32.mrf.mxu1 }
 0x10d   :  { %v98_v27 = vadd.f32 %v97_v21, %v69_v20 }
 0x10f   :  { %117 = vmatpush.msra.mxu2 %v98_v27  ;;  %v124_v28 = vmul.f32 %v98_v27, %v98_v27 }
 0x111   :  { %118 = vmatpush.msra.mxu2 %v95_v26  ;;  %139 = vmatpush.msra.mxu3 %v124_v28 }
 0x112   :  { %434 = vmatmul.msk.f32.vlgmr.msra.gmra.mxu2 %vm37_vm0, %v541_v29 }
 0x113   :  { %140 = vmatpush.msra.mxu3 %v123_v30  ;;  %191 = vmatpush.msrb.mxu2 %v25_v31 }
 0x114   :  { %435 = vmatmul.msk.f32.vlgmr.msra.gmra.mxu3 %vm37_vm0, %v541_v29 }
 0x115   :  { %192 = vmatpush.msrb.mxu2 %v24_v32 }
 0x117   :  { %193 = vmatpush.msrb.mxu2 %v23_v33 }
 0x119   :  { %194 = vmatpush.msrb.mxu2 %v22_v34 }
 0x195   :  { %v120_v35 = vpop.f32.mrf.mxu2 }
 0x196   :  { %v145_v36 = vmul.f32 %v120_v35, %v120_v35 }
 0x197   :  { %v142_v37 = vpop.f32.mrf.mxu3 }
 0x198   :  { %v146_v38 = vsub.f32 %v142_v37, %v145_v36 }
 0x19a   :  { %v147_v39 = vmax.f32 %v146_v38, 0.0 }
 0x19c   :  { %v148_v40 = vadd.f32 1e-05, %v147_v39 }
 0x19e   :  { %455 = vrsqrt.f32 %v148_v40  ;;  %vm155_vm5 = vweird.f32 %v148_v40 }
 0x1a4   :  { %v456_v41 = vpop.eup %455 }
 0x1a5   :  { %v150_v42 = vmul.f32 %v456_v41, %v148_v40  ;;  %vm156_vm4 = vweird.f32 %v456_v41  ;;  %v352_v40 = vpop.xlane.xlu0 %351 }
 0x1a6   :  { %vm157_vm6 = vmor %vm155_vm5, %vm156_vm4 }
 0x1a7   :  { %v151_v43 = vmul.f32 %v456_v41, %v150_v42 }
 0x1a9   :  { %v152_v44 = vmul.f32 0.5, %v151_v43 }
 0x1ab   :  { %v153_v45 = vsub.f32 1.5, %v152_v44 }
 0x1ad   :  { %v154_v47 = vmul.f32 %v456_v41, %v153_v45 }
 0x1af   :  { %v158_v48 = vsel %vm157_vm6, %v456_v41, %v154_v47  ;;  %v353_v41 = vrot.slane %v352_v40, 4  ;;  %vm424_vm6 = vcmask 23552  }
 0x1b0   :  { %v160_v49 = vmul.f32 %v159_v46, %v158_v48 }
 0x1b1   :  { %v354_v42 = vmin.f32 %v352_v40, %v353_v41 }
 0x1b2   :  { %v161_v51 = vmul.f32 %v160_v49, %v120_v35  ;;  %v164_v52 = vperm.slane %v160_v49, 0  ;;  %v168_v57 = vperm.slane %v160_v49, 1 }
 0x1b3   :  { %v355_v43 = vrot.slane %v354_v42, 2 }
 0x1b4   :  { %v163_v53 = vsub.f32 %v162_v50, %v161_v51  ;;  %v165_v54 = vmul.f32 %v164_v52, %v95_v26  ;;  %v169_v59 = vmul.f32 %v168_v57, %v98_v27  ;;  %v263_v26 = vperm.slane %v528_v8, 6 }
 0x1b5   :  { %v471_v8 = vmov 1.0   ;;  %v356_v44 = vmin.f32 %v354_v42, %v355_v43 }
 0x1b6   :  { %v166_v55 = vperm.slane %v163_v53, 0  ;;  %v170_v58 = vperm.slane %v163_v53, 1 }
 0x1b7   :  { %v357_v45 = vrot.slane %v356_v44, 1 }
 0x1b8   :  { %v167_v56 = vadd.f32 %v166_v55, %v165_v54  ;;  %v171_v60 = vadd.f32 %v170_v58, %v169_v59 }
 0x1b9   :  { %v358_v46 = vmin.f32 %v356_v44, %v357_v45 }
 0x1ba   :  { %436 = vmatmul.msk.f32.vlgmr.msrb.gmra.mxu2 %vm70_vm1, %v167_v56 }
 0x1bb   :  { %447 = vpush %v358_v46 }
 0x1c2   :  { %437 = vmatmul.msk.f32.gmra.mxu2 %vm70_vm1, %v171_v60 }
 0x1ec   :  { %s448_s2 = spop %447 }
 0x1ed   :  { %p360_p0 = scmp.gt.f32.partialorder %s448_s2, 0.0 }
 0x1ef   :  { %s362_s10 = scalar_select %p360_p0, 1, 0 }
 0x23d   :  { %v196_v61 = vpop.f32.mrf.mxu2 }
 0x23e   :  { %v197_v63 = vadd.f32 %v196_v61, %v172_v62  ;;  %v363_v61 = vstv %s362_s10 }
 0x23f   :  { %vm364_vm12 = vcmp.eq.s32.totalorder %v363_v61, 1 }
 0x240   :  { %457 = vtanh.f32 %v197_v63 }
 0x245   :  { %v199_v0 = vpop.f32.mrf.mxu2 }
 0x246   :  { %v200_v1 = vadd.f32 %v199_v0, %v172_v62  ;;  %v458_v3 = vpop.eup %457 }
 0x247   :  { %v224_v7 = vmul.f32 %v458_v3, %v458_v3 }
 0x248   :  { %459 = vtanh.f32 %v200_v1 }
 0x24e   :  { %v460_v5 = vpop.eup %459 }
 0x24f   :  { %218 = vmatpush.msrb.mxu3 %v460_v5  ;;  %v225_v6 = vmul.f32 %v460_v5, %v460_v5 }
 0x251   :  { %219 = vmatpush.msrb.mxu3 %v458_v3  ;;  %240 = vmatpush.msrb.mxu0 %v225_v6 }
 0x252   :  { %438 = vmatmul.msk.f32.vlgmr.msrb.gmra.mxu3 %vm37_vm0, %v541_v29 }
 0x253   :  { %241 = vmatpush.msrb.mxu0 %v224_v7  ;;  %v392_v7 = vld [vmem:[%s593_s1] sm:$0xff] }
 0x254   :  { %439 = vmatmul.msk.f32.vlgmr.msrb.gmra.mxu0 %vm37_vm0, %v541_v29  ;;  %vm365_vm0 = vmand %vm364_vm12, %vm361_vm14  ;;  %394 = vperm.xlu2 %453, %v392_v7  }
 0x2d1   :  { %v243_v12 = vpop.f32.mrf.mxu0 }
 0x2d5   :  { %v221_v11 = vpop.f32.mrf.mxu3 }
 0x2d6   :  { %v246_v13 = vmul.f32 %v221_v11, %v221_v11 }
 0x2d8   :  { %v247_v14 = vsub.f32 %v243_v12, %v246_v13 }
 0x2da   :  { %v248_v15 = vmax.f32 %v247_v14, 0.0  ;;  %v395_v14 = vpop.permute.xlu2 %394 }
 0x2dc   :  { %v249_v16 = vadd.f32 1e-05, %v248_v15 }
 0x2de   :  { %461 = vrsqrt.f32 %v249_v16  ;;  %vm256_vm9 = vweird.f32 %v249_v16 }
 0x2e4   :  { %v462_v17 = vpop.eup %461 }
 0x2e5   :  { %v251_v20 = vmul.f32 %v462_v17, %v249_v16  ;;  %vm257_vm8 = vweird.f32 %v462_v17 }
 0x2e6   :  { %vm258_vm10 = vmor %vm256_vm9, %vm257_vm8 }
 0x2e7   :  { %v252_v21 = vmul.f32 %v462_v17, %v251_v20 }
 0x2e9   :  { %v253_v23 = vmul.f32 0.5, %v252_v21 }
 0x2eb   :  { %v254_v24 = vsub.f32 1.5, %v253_v23 }
 0x2ed   :  { %v255_v4 = vmul.f32 %v462_v17, %v254_v24 }
 0x2ef   :  { %v259_v22 = vsel %vm258_vm10, %v462_v17, %v255_v4 }
 0x2f0   :  { %v261_v25 = vmul.f32 %v260_v2, %v259_v22 }
 0x2f2   :  { %v262_v27 = vmul.f32 %v261_v25, %v221_v11  ;;  %v269_v28 = vperm.slane %v261_v25, 1  ;;  %v265_v29 = vperm.slane %v261_v25, 0 }
 0x2f4   :  { %v264_v30 = vsub.f32 %v263_v26, %v262_v27  ;;  %v270_v31 = vmul.f32 %v460_v5, %v269_v28  ;;  %v266_v33 = vmul.f32 %v458_v3, %v265_v29 }
 0x2f6   :  { %v271_v32 = vperm.slane %v264_v30, 1  ;;  %v267_v34 = vperm.slane %v264_v30, 0 }
 0x2f8   :  { %v272_v35 = vadd.f32 %v271_v32, %v270_v31  ;;  %v268_v36 = vadd.f32 %v267_v34, %v266_v33 }
 0x2fa   :  { %440 = vmatpush.xpose.msk.msra.mxu3 %vm70_vm1, %v272_v35  ;;  %v303_v37 = vmul.f32 %v272_v35, %v272_v35  ;;  %v299_v38 = vmul.f32 %v268_v36, %v268_v36 }
 0x2fc   :  { %442 = vmatpush.xpose.msk.msrb.mxu1 %vm70_vm1, %v303_v37  ;;  %v300_v39 = vsel %vm70_vm1, %v299_v38, 0.0 }
 0x2fd   :  { %301 = vadd.xlane.f32.xlu0 %v300_v39  ;;  %441 = vmatmul.msk.f32.vlgmr.msra.gmra.mxu3 %vm70_vm1, %v268_v36 }
 0x2ff   :  { %443 = vmatmul.msk.f32.vlgmr.msrb.gmra.mxu1 %vm70_vm1, %v471_v8  ;;  %vm396_vm1 = vcmp.eq.s32.totalorder %v533_v18, %v395_v14 }
 0x300   :  { %445 = vmatpush.msk.msra.mxu0 %vm396_vm1, %v471_v8 }
 0x370   :  { %v302_v49 = vpop.xlane.xlu0 %301 }
 0x37c   :  { %v327_v47 = vpop.f32.mrf.mxu1 }
 0x37d   :  { %v330_v48 = vperm.slane %v327_v47, 0 }
 0x37f   :  { %v331_v51 = vadd.f32 %v330_v48, %v302_v49 }
 0x380   :  { %v296_v50 = vpop.f32.mrf.mxu3 }
 0x381   :  { %v332_v52 = vmul.f32 2.0, %v296_v50 }
 0x383   :  { %v333_v53 = vsub.f32 %v331_v51, %v332_v52 }
 0x385   :  { %v334_v54 = vmax.f32 %v333_v53, 0.0 }
 0x387   :  { %463 = vrsqrt.f32 %v334_v54  ;;  %vm342_vm11 = vcmp.eq.f32.partialorder %v334_v54, inf  ;;  %v345_v63 = vand.u32 2147483648, %v334_v54  ;;  %vm344_vm13 = vcmp.eq.f32.partialorder %v334_v54, 0.0 }
 0x38d   :  { %v464_v55 = vpop.eup %463 }
 0x38e   :  { %v336_v56 = vmul.f32 %v464_v55, %v334_v54 }
 0x390   :  { %v337_v57 = vmul.f32 %v464_v55, %v336_v56 }
 0x392   :  { %v338_v58 = vmul.f32 0.5, %v337_v57 }
 0x394   :  { %v339_v59 = vsub.f32 1.5, %v338_v58 }
 0x396   :  { %v340_v60 = vmul.f32 %v464_v55, %v339_v59 }
 0x398   :  { %v341_v62 = vmul.f32 %v340_v60, %v334_v54 }
 0x39a   :  { %v343_v0 = vsel %vm342_vm11, %v334_v54, %v341_v62 }
 0x39b   :  { %v346_v1 = vsel %vm344_vm13, %v345_v63, %v343_v0 }
 0x39c   :  { %v347_v3 = vsub.f32 0.0, %v346_v1 }
 0x39e   :  { %v366_v5 = vsel %vm365_vm0, -inf, %v347_v3 }
 0x39f   :  { %v368_v6 = vsel %vm367_vm15, %v366_v5, -inf }
 0x3a0   :  { %369 = vmax.xlane.f32.xlu1 %v368_v6 }
 0x413   :  { %v370_v10 = vpop.xlane.xlu1 %369 }
 0x414   :  { %v371_v11 = vsub.f32 %v366_v5, %v370_v10 }
 0x416   :  { %v372_v12 = vmul.f32 1.442695, %v371_v11 }
 0x418   :  { %465 = vpow2.f32 %v372_v12 }
 0x41e   :  { %v466_v19 = vpop.eup %465 }
 0x41f   :  { %v374_v13 = vsel %vm367_vm15, %v466_v19, 0.0 }
 0x420   :  { %375 = vadd.xlane.f32.xlu1 %v374_v13 }
 0x493   :  { %v376_v15 = vpop.xlane.xlu1 %375 }
 0x494   :  { %467 = vrcp.f32 %v376_v15  ;;  %v388_v21 = vand.u32 2147483648, %v376_v15  ;;  %v386_v24 = vand.u32 2147483647, %v376_v15  ;;  %vm382_vm3 = vweird.f32 %v376_v15 }
 0x496   :  { %v389_v4 = vor.u32 1.1754944e-38, %v388_v21  ;;  %vm387_vm5 = vcmp.eq.f32.partialorder %v386_v24, 8.507059e+37 }
 0x49a   :  { %v468_v16 = vpop.eup %467 }
 0x49b   :  { %v378_v17 = vmul.f32 %v468_v16, %v376_v15  ;;  %vm383_vm2 = vweird.f32 %v468_v16 }
 0x49c   :  { %vm384_vm4 = vmor %vm382_vm3, %vm383_vm2 }
 0x49d   :  { %v379_v20 = vsub.f32 1.0, %v378_v17 }
 0x49f   :  { %v380_v23 = vmul.f32 %v468_v16, %v379_v20 }
 0x4a1   :  { %v381_v2 = vadd.f32 %v468_v16, %v380_v23 }
 0x4a3   :  { %v385_v22 = vsel %vm384_vm4, %v468_v16, %v381_v2 }
 0x4a4   :  { %v390_v25 = vsel %vm387_vm5, %v389_v4, %v385_v22 }
 0x4a5   :  { %v391_v26 = vmul.f32 %v466_v19, %v390_v25 }
 0x4a7   :  { %446 = vmatmul.msk.f32.vlgmr.msra.gmra.mxu0 %vm367_vm15, %v391_v26 }
 0x524   :  { %v419_v18 = vpop.f32.mrf.mxu0 }
 0x525   :  { %v422_v27 = vmax.f32 %v419_v18, 0.0 }
 0x527   :  { %v423_v28 = vmin.f32 %v422_v27, 1.0 }
 0x529   :  { %425 = vst.msk [vmem:[%s594_s3] sm:$0xff] %vm424_vm6, %v423_v28 }

</bundles_post_ra>
